<compile_context>
chip_gen: v6e
topology: v6e:2x2x1
jax: 0.10.0
libtpu: 0.0.40
codegen_flags: <defaults>
</compile_context>

<pallas_src>
import functools

import jax
import jax.numpy as jnp
import numpy as np
from jax.experimental import pallas as pl
from jax.experimental.pallas import tpu as pltpu


def _round_up(x, m):
    return (x + m - 1) // m * m


def _lstm_kernel(x_ref, wih_ref, whh_ref, b_ref, wlab_ref, blab_ref,
                 logp_ref, hn_ref, cn_ref, gx_ref, *, seq_len, num_labels):
    """One grid step == one batch tile; full time recurrence inside the body.

    Phase 1: hoisted input projection for ALL time steps (one MXU matmul).
    Phase 2: serial recurrence (lax.fori_loop); only h @ W_hh^T per step.
    Phase 3: classifier head + masked stable log_softmax into a lane-dense slab.
    """
    bt, hp = hn_ref.shape                      # batch tile, padded hidden (128k)
    cdt = whh_ref.dtype                        # matmul compute dtype (bf16/f32)

    # ---- Phase 1: x @ W_ih^T + b for all time steps at once ----
    xm = x_ref[0]                              # (seq*bt, E)
    gx_ref[...] = (jnp.dot(xm, wih_ref[...], preferred_element_type=jnp.float32)
                   + b_ref[...])               # (seq*bt, 4Hp) f32, bias folded

    whh = whh_ref[...]                         # loop-invariant, load once

    # ---- Phase 2: serial LSTM recurrence; h/c carried in registers ----
    def step(t, carry):
        h, c = carry                           # f32 (bt, hp)
        row = pl.multiple_of(t * bt, bt)
        gates = gx_ref[pl.ds(row, bt), :] + jnp.dot(
            h.astype(cdt), whh, preferred_element_type=jnp.float32)
        # PyTorch gate order i, f, g, o; hp is a multiple of 128 -> aligned views.
        i_g = jax.nn.sigmoid(gates[:, 0 * hp:1 * hp])
        f_g = jax.nn.sigmoid(gates[:, 1 * hp:2 * hp])
        g_g = jnp.tanh(gates[:, 2 * hp:3 * hp])
        o_g = jax.nn.sigmoid(gates[:, 3 * hp:4 * hp])
        c_new = f_g * c + i_g * g_g
        h_new = o_g * jnp.tanh(c_new)
        return h_new, c_new

    h0 = jnp.zeros((bt, hp), jnp.float32)
    c0 = jnp.zeros((bt, hp), jnp.float32)
    h_n, c_n = jax.lax.fori_loop(0, seq_len, step, (h0, c0))

    # ---- Phase 3: hidden2label + log_softmax over the real label lanes ----
    y = (jnp.dot(h_n.astype(cdt), wlab_ref[...],
                 preferred_element_type=jnp.float32) + blab_ref[...])  # (bt, Lp)
    lane = jax.lax.broadcasted_iota(jnp.int32, y.shape, 1)
    y = jnp.where(lane < num_labels, y, -1e30)          # mask padded label lanes
    m = jnp.max(y, axis=-1, keepdims=True)
    z = y - m
    lse = jnp.log(jnp.sum(jnp.exp(z), axis=-1, keepdims=True))
    logp_ref[...] = z - lse
    hn_ref[...] = h_n
    cn_ref[...] = c_n


def lstm_classifier_forward(sentence, params, *, compute_dtype=jnp.float32,
                            batch_tile=8):
    """sentence: (seq_len, batch) int32 token ids. Returns (log_probs, (h_n, c_n))."""
    emb = params["embedding"]            # (vocab, E)
    w_ih = params["w_ih"]                # (4H, E), PyTorch gate order i,f,g,o
    w_hh = params["w_hh"]                # (4H, H)
    w_lab = params["w_label"]            # (L, H)
    b_lab = params["b_label"]            # (L,)

    seq_len, batch = sentence.shape
    E = emb.shape[1]
    H = w_hh.shape[1]
    L = w_lab.shape[0]

    # Pad to TPU-friendly shapes. Zero padding is exact: padded gate
    # pre-activations are exactly 0, so padded h/c stay exactly 0 forever.
    Hp = _round_up(H, 128)               # lane-aligned gate slices
    Lp = _round_up(L, 128)               # lane-dense classifier output
    Bp = _round_up(batch, batch_tile)    # >= 8 sublanes
    nb = Bp // batch_tile

    # ---- glue: embedding gather + weight layout prep (not the hot path) ----
    # TODO(synk): embedding gather stays in XLA (data-dependent row gather).
    x = jnp.take(emb, sentence, axis=0)                       # (seq, B, E) f32
    x = jnp.pad(x, ((0, 0), (0, Bp - batch), (0, 0)))
    # -> (nb, seq*batch_tile, E): each batch tile is a 2D matmul-ready slab
    # (row index = t*batch_tile + local_batch).
    x = (x.reshape(seq_len, nb, batch_tile, E)
           .transpose(1, 0, 2, 3)
           .reshape(nb, seq_len * batch_tile, E)
           .astype(compute_dtype))

    def pad_gates(w):    # (4H, cols) -> (4, Hp, cols): gate k occupies rows k*Hp+
        return jnp.pad(w.reshape(4, H, -1), ((0, 0), (0, Hp - H), (0, 0)))

    wih_t = jnp.transpose(pad_gates(w_ih), (2, 0, 1)).reshape(E, 4 * Hp)
    whh4 = jnp.pad(pad_gates(w_hh), ((0, 0), (0, 0), (0, Hp - H)))
    whh_t = jnp.transpose(whh4, (2, 0, 1)).reshape(Hp, 4 * Hp)
    b = jnp.pad((params["b_ih"] + params["b_hh"]).reshape(4, H),
                ((0, 0), (0, Hp - H))).reshape(1, 4 * Hp).astype(jnp.float32)
    wlab_t = jnp.pad(w_lab, ((0, Lp - L), (0, Hp - H))).T     # (Hp, Lp)
    blab = jnp.pad(b_lab, (0, Lp - L)).reshape(1, Lp).astype(jnp.float32)

    # bf16 operands hit the fast MXU path; accumulation & elementwise stay f32.
    wih_t = wih_t.astype(compute_dtype)
    whh_t = whh_t.astype(compute_dtype)
    wlab_t = wlab_t.astype(compute_dtype)

    out_shapes = (
        jax.ShapeDtypeStruct((Bp, Lp), jnp.float32),   # log_probs (padded)
        jax.ShapeDtypeStruct((Bp, Hp), jnp.float32),   # h_n (padded)
        jax.ShapeDtypeStruct((Bp, Hp), jnp.float32),   # c_n (padded)
    )

    grid_spec = pltpu.PrefetchScalarGridSpec(
        num_scalar_prefetch=0,
        grid=(nb,),                                    # independent batch tiles
        in_specs=[
            pl.BlockSpec((1, seq_len * batch_tile, E), lambda b: (b, 0, 0)),
            pl.BlockSpec((E, 4 * Hp), lambda b: (0, 0)),     # W_ih^T (gate-padded)
            pl.BlockSpec((Hp, 4 * Hp), lambda b: (0, 0)),    # W_hh^T
            pl.BlockSpec((1, 4 * Hp), lambda b: (0, 0)),     # fused bias
            pl.BlockSpec((Hp, Lp), lambda b: (0, 0)),        # W_label^T
            pl.BlockSpec((1, Lp), lambda b: (0, 0)),         # b_label
        ],
        out_specs=[
            pl.BlockSpec((batch_tile, Lp), lambda b: (b, 0)),
            pl.BlockSpec((batch_tile, Hp), lambda b: (b, 0)),
            pl.BlockSpec((batch_tile, Hp), lambda b: (b, 0)),
        ],
        scratch_shapes=[
            pltpu.VMEM((seq_len * batch_tile, 4 * Hp), jnp.float32),  # gates_x
        ],
    )

    flops = int(2 * seq_len * Bp * E * 4 * Hp          # hoisted input projection
                + 2 * seq_len * Bp * Hp * 4 * Hp       # recurrence
                + 2 * Bp * Hp * Lp)                    # classifier head
    transc = int(5 * seq_len * Bp * Hp + Bp * Lp)
    in_bytes = sum(int(np.prod(a.shape)) * a.dtype.itemsize
                   for a in (x, wih_t, whh_t, b, wlab_t, blab))
    out_bytes = 4 * (Bp * Lp + 2 * Bp * Hp)
    cost = pl.CostEstimate(flops=flops, transcendentals=transc,
                           bytes_accessed=int(in_bytes + out_bytes))

    kernel = functools.partial(_lstm_kernel, seq_len=seq_len, num_labels=L)

    logp_p, hn_p, cn_p = pl.pallas_call(
        kernel,
        out_shape=out_shapes,
        grid_spec=grid_spec,
        compiler_params=pltpu.CompilerParams(
            # batch tiles are independent -> shard across TensorCores (v7x);
            # the serial time recurrence is entirely inside the kernel body.
            dimension_semantics=("parallel",),
            vmem_limit_bytes=32 * 1024 * 1024,
        ),
        cost_estimate=cost,
    )(x, wih_t, whh_t, b, wlab_t, blab)

    log_probs = logp_p[:batch, :L]
    h_n = hn_p[:batch, :H]
    c_n = cn_p[:batch, :H]
    # PyTorch returns hidden as (num_layers=1, batch, hidden)
    return log_probs, (h_n[None], c_n[None])


def init_params(key, vocab_size, embedding_dim, hidden_dim, label_size):
    ks = jax.random.split(key, 7)
    scale = 0.1
    return {
        "embedding": scale * jax.random.normal(ks[0], (vocab_size, embedding_dim), jnp.float32),
        "w_ih": scale * jax.random.normal(ks[1], (4 * hidden_dim, embedding_dim), jnp.float32),
        "w_hh": scale * jax.random.normal(ks[2], (4 * hidden_dim, hidden_dim), jnp.float32),
        "b_ih": scale * jax.random.normal(ks[3], (4 * hidden_dim,), jnp.float32),
        "b_hh": scale * jax.random.normal(ks[4], (4 * hidden_dim,), jnp.float32),
        "w_label": scale * jax.random.normal(ks[5], (label_size, hidden_dim), jnp.float32),
        "b_label": scale * jax.random.normal(ks[6], (label_size,), jnp.float32),
    }


def reference_forward(sentence, params):
    """Pure-JAX reference matching PyTorch semantics, for verification."""
    emb = params["embedding"]
    w_ih, w_hh = params["w_ih"], params["w_hh"]
    b = params["b_ih"] + params["b_hh"]
    x = jnp.take(emb, sentence, axis=0)
    seq_len, batch = sentence.shape
    H = w_hh.shape[1]
    h = jnp.zeros((batch, H), jnp.float32)
    c = jnp.zeros((batch, H), jnp.float32)
    for t in range(seq_len):
        gates = x[t] @ w_ih.T + h @ w_hh.T + b
        i = jax.nn.sigmoid(gates[:, 0 * H:1 * H])
        f = jax.nn.sigmoid(gates[:, 1 * H:2 * H])
        g = jnp.tanh(gates[:, 2 * H:3 * H])
        o = jax.nn.sigmoid(gates[:, 3 * H:4 * H])
        c = f * c + i * g
        h = o * jnp.tanh(c)
    y = h @ params["w_label"].T + params["b_label"]
    return jax.nn.log_softmax(y, axis=1), (h[None], c[None])


if __name__ == "__main__":
    seq_len, batch = 8, 2
    embedding_dim, hidden_dim = 16, 32
    vocab_size, label_size = 50, 4

    key = jax.random.PRNGKey(0)
    pkey, skey = jax.random.split(key)
    params = init_params(pkey, vocab_size, embedding_dim, hidden_dim, label_size)
    sentence = jax.random.randint(skey, (seq_len, batch), 0, vocab_size, jnp.int32)

    ref_lp, (ref_h, ref_c) = reference_forward(sentence, params)

    # f32 matmul path: tight check against the pure-JAX reference.
    lp32, (h32, c32) = lstm_classifier_forward(sentence, params,
                                               compute_dtype=jnp.float32)
    jax.block_until_ready((lp32, h32, c32))
    np.testing.assert_allclose(np.asarray(lp32), np.asarray(ref_lp), atol=1e-5, rtol=1e-5)
    np.testing.assert_allclose(np.asarray(h32), np.asarray(ref_h), atol=1e-5, rtol=1e-5)
    np.testing.assert_allclose(np.asarray(c32), np.asarray(ref_c), atol=1e-5, rtol=1e-5)

    # bf16 matmul-operand path (fast MXU path on v5e/v6e/v7x); f32 accumulation
    # and f32 gate math keep it close to the f32 reference.
    lpbf, (hbf, cbf) = lstm_classifier_forward(sentence, params,
                                               compute_dtype=jnp.bfloat16)
    jax.block_until_ready((lpbf, hbf, cbf))
    np.testing.assert_allclose(np.asarray(lpbf), np.asarray(ref_lp), atol=2e-2, rtol=2e-2)
    np.testing.assert_allclose(np.asarray(hbf), np.asarray(ref_h), atol=2e-2, rtol=2e-2)
    np.testing.assert_allclose(np.asarray(cbf), np.asarray(ref_c), atol=2e-2, rtol=2e-2)

    print("KERNEL_OK")
</pallas_src>

<mosaic_0001>
module attributes {stable_mosaic.version = 11 : i64} {
  func.func @_lstm_kernel(%arg0: i32, %arg1: memref<1x64x16xf32, #tpu.memory_space<vmem>>, %arg2: memref<16x512xf32, #tpu.memory_space<vmem>>, %arg3: memref<128x512xf32, #tpu.memory_space<vmem>>, %arg4: memref<1x512xf32, #tpu.memory_space<vmem>>, %arg5: memref<128x128xf32, #tpu.memory_space<vmem>>, %arg6: memref<1x128xf32, #tpu.memory_space<vmem>>, %arg7: memref<8x128xf32, #tpu.memory_space<vmem>>, %arg8: memref<8x128xf32, #tpu.memory_space<vmem>>, %arg9: memref<8x128xf32, #tpu.memory_space<vmem>>, %arg10: memref<64x512xf32, #tpu.memory_space<vmem>>) attributes {dimension_semantics = [#tpu.dimension_semantics<parallel>], iteration_bounds = array<i64: 1>, scalar_prefetch = 0 : i64, scratch_operands = 1 : i64, tpu.core_type = #tpu.core_type<tc>, window_params = [{transform_indices = @transform_0, window_bounds = array<i64: 1, 64, 16>}, {pipeline_mode = #tpu.pipeline_mode<synchronous>, transform_indices = @transform_1, window_bounds = array<i64: 16, 512>}, {pipeline_mode = #tpu.pipeline_mode<synchronous>, transform_indices = @transform_2, window_bounds = array<i64: 128, 512>}, {pipeline_mode = #tpu.pipeline_mode<synchronous>, transform_indices = @transform_3, window_bounds = array<i64: 1, 512>}, {pipeline_mode = #tpu.pipeline_mode<synchronous>, transform_indices = @transform_4, window_bounds = array<i64: 128, 128>}, {pipeline_mode = #tpu.pipeline_mode<synchronous>, transform_indices = @transform_5, window_bounds = array<i64: 1, 128>}, {transform_indices = @transform_6, window_bounds = array<i64: 8, 128>}, {transform_indices = @transform_7, window_bounds = array<i64: 8, 128>}, {transform_indices = @transform_8, window_bounds = array<i64: 8, 128>}]} {
    %c0 = arith.constant 0 : index
    %c0_0 = arith.constant 0 : index
    %c0_1 = arith.constant 0 : index
    %0 = vector.load %arg1[%c0, %c0_0, %c0_1] : memref<1x64x16xf32, #tpu.memory_space<vmem>>, vector<1x64x16xf32>
    %1 = vector.shape_cast %0 : vector<1x64x16xf32> to vector<64x16xf32>
    %c0_2 = arith.constant 0 : index
    %c0_3 = arith.constant 0 : index
    %2 = vector.load %arg2[%c0_2, %c0_3] : memref<16x512xf32, #tpu.memory_space<vmem>>, vector<16x512xf32>
    %cst = arith.constant dense<0.000000e+00> : vector<64x512xf32>
    %3 = tpu.matmul %1, %2, %cst {dimension_numbers = #tpu.dot_dimension_numbers<[1], [0], [0], [1], [0, 0, 1, 1], [], []>} : vector<64x16xf32>, vector<16x512xf32>, vector<64x512xf32> -> vector<64x512xf32>
    %c0_4 = arith.constant 0 : index
    %c0_5 = arith.constant 0 : index
    %4 = vector.load %arg4[%c0_4, %c0_5] : memref<1x512xf32, #tpu.memory_space<vmem>>, vector<1x512xf32>
    %5 = vector.broadcast %4 : vector<1x512xf32> to vector<64x512xf32>
    %6 = arith.addf %3, %5 : vector<64x512xf32>
    %c0_6 = arith.constant 0 : index
    %c0_7 = arith.constant 0 : index
    %7 = vector.load %arg10[%c0_6, %c0_7] : memref<64x512xf32, #tpu.memory_space<vmem>>, vector<64x512xf32>
    tpu.vector_store %arg10[%c0_6, %c0_7], %6 {strides = array<i32>} : memref<64x512xf32, #tpu.memory_space<vmem>>, vector<64x512xf32>,
    %c0_8 = arith.constant 0 : index
    %c0_9 = arith.constant 0 : index
    %8 = vector.load %arg3[%c0_8, %c0_9] : memref<128x512xf32, #tpu.memory_space<vmem>>, vector<128x512xf32>
    %cst_10 = arith.constant 0.000000e+00 : f32
    %9 = vector.broadcast %cst_10 : f32 to vector<8x128xf32>
    %cst_11 = arith.constant 0.000000e+00 : f32
    %10 = vector.broadcast %cst_11 : f32 to vector<8x128xf32>
    %c0_i32 = arith.constant 0 : i32
    %c8_i32 = arith.constant 8 : i32
    %11 = arith.addi %c0_i32, %c8_i32 : i32
    %c1_i32 = arith.constant 1 : i32
    %12:2 = scf.for %arg11 = %c0_i32 to %11 step %c1_i32 iter_args(%arg12 = %9, %arg13 = %10) -> (vector<8x128xf32>, vector<8x128xf32>)  : i32 {
      %c8_i32_27 = arith.constant 8 : i32
      %36 = arith.muli %arg11, %c8_i32_27 : i32
      %37 = tpu.assume_multiple %36, 8 : i32
      %38 = arith.index_cast %37 : i32 to index
      %c0_28 = arith.constant 0 : index
      %39 = vector.load %arg10[%38, %c0_28] : memref<64x512xf32, #tpu.memory_space<vmem>>, vector<8x512xf32>
      %cst_29 = arith.constant dense<0.000000e+00> : vector<8x512xf32>
      %40 = tpu.matmul %arg12, %8, %cst_29 {dimension_numbers = #tpu.dot_dimension_numbers<[1], [0], [0], [1], [0, 0, 1, 1], [], []>} : vector<8x128xf32>, vector<128x512xf32>, vector<8x512xf32> -> vector<8x512xf32>
      %41 = arith.addf %39, %40 : vector<8x512xf32>
      %42 = vector.extract_strided_slice %41 {offsets = [0, 0], sizes = [8, 128], strides = [1, 1]} : vector<8x512xf32> to vector<8x128xf32>
      %43 = arith.negf %42 : vector<8x128xf32>
      %44 = math.exp %43 : vector<8x128xf32>
      %cst_30 = arith.constant 1.000000e+00 : f32
      %45 = vector.broadcast %cst_30 : f32 to vector<8x128xf32>
      %46 = arith.addf %45, %44 : vector<8x128xf32>
      %47 = arith.divf %45, %46 : vector<8x128xf32>
      %48 = vector.extract_strided_slice %41 {offsets = [0, 128], sizes = [8, 128], strides = [1, 1]} : vector<8x512xf32> to vector<8x128xf32>
      %49 = arith.negf %48 : vector<8x128xf32>
      %50 = math.exp %49 : vector<8x128xf32>
      %cst_31 = arith.constant 1.000000e+00 : f32
      %51 = vector.broadcast %cst_31 : f32 to vector<8x128xf32>
      %52 = arith.addf %51, %50 : vector<8x128xf32>
      %53 = arith.divf %51, %52 : vector<8x128xf32>
      %54 = vector.extract_strided_slice %41 {offsets = [0, 256], sizes = [8, 128], strides = [1, 1]} : vector<8x512xf32> to vector<8x128xf32>
      %55 = math.tanh %54 : vector<8x128xf32>
      %56 = vector.extract_strided_slice %41 {offsets = [0, 384], sizes = [8, 128], strides = [1, 1]} : vector<8x512xf32> to vector<8x128xf32>
      %57 = arith.negf %56 : vector<8x128xf32>
      %58 = math.exp %57 : vector<8x128xf32>
      %cst_32 = arith.constant 1.000000e+00 : f32
      %59 = vector.broadcast %cst_32 : f32 to vector<8x128xf32>
      %60 = arith.addf %59, %58 : vector<8x128xf32>
      %61 = arith.divf %59, %60 : vector<8x128xf32>
      %62 = arith.mulf %53, %arg13 : vector<8x128xf32>
      %63 = arith.mulf %47, %55 : vector<8x128xf32>
      %64 = arith.addf %62, %63 : vector<8x128xf32>
      %65 = math.tanh %64 : vector<8x128xf32>
      %66 = arith.mulf %61, %65 : vector<8x128xf32>
      scf.yield %66, %64 : vector<8x128xf32>, vector<8x128xf32>
    }
    %c8_i32_12 = arith.constant 8 : i32
    %c0_13 = arith.constant 0 : index
    %c0_14 = arith.constant 0 : index
    %13 = vector.load %arg5[%c0_13, %c0_14] : memref<128x128xf32, #tpu.memory_space<vmem>>, vector<128x128xf32>
    %cst_15 = arith.constant dense<0.000000e+00> : vector<8x128xf32>
    %14 = tpu.matmul %12#0, %13, %cst_15 {dimension_numbers = #tpu.dot_dimension_numbers<[1], [0], [0], [1], [0, 0, 1, 1], [], []>} : vector<8x128xf32>, vector<128x128xf32>, vector<8x128xf32> -> vector<8x128xf32>
    %c0_16 = arith.constant 0 : index
    %c0_17 = arith.constant 0 : index
    %15 = vector.load %arg6[%c0_16, %c0_17] : memref<1x128xf32, #tpu.memory_space<vmem>>, vector<1x128xf32>
    %16 = vector.broadcast %15 : vector<1x128xf32> to vector<8x128xf32>
    %17 = arith.addf %14, %16 : vector<8x128xf32>
    %18 = tpu.iota {dimensions = array<i32: 1>} : vector<8x128xi32>
    %c4_i32 = arith.constant 4 : i32
    %19 = vector.broadcast %c4_i32 : i32 to vector<8x128xi32>
    %20 = arith.cmpi slt, %18, %19 : vector<8x128xi32>
    %cst_18 = arith.constant -1.000000e+30 : f32
    %21 = vector.broadcast %cst_18 : f32 to vector<8x128xf32>
    %22 = arith.select %20, %17, %21 : vector<8x128xi1>, vector<8x128xf32>
    %cst_19 = arith.constant dense<0xFF800000> : vector<8xf32>
    %23 = vector.multi_reduction <maximumf>, %22, %cst_19 [1] : vector<8x128xf32> to vector<8xf32>
    %24 = vector.shape_cast %23 : vector<8xf32> to vector<8x1xf32>
    %25 = vector.broadcast %24 : vector<8x1xf32> to vector<8x128xf32>
    %26 = arith.subf %22, %25 : vector<8x128xf32>
    %27 = math.exp %26 : vector<8x128xf32>
    %cst_20 = arith.constant dense<0.000000e+00> : vector<8xf32>
    %28 = vector.multi_reduction <add>, %27, %cst_20 [1] : vector<8x128xf32> to vector<8xf32>
    %29 = vector.shape_cast %28 : vector<8xf32> to vector<8x1xf32>
    %30 = math.log %29 : vector<8x1xf32>
    %31 = vector.broadcast %30 : vector<8x1xf32> to vector<8x128xf32>
    %32 = arith.subf %26, %31 : vector<8x128xf32>
    %c0_21 = arith.constant 0 : index
    %c0_22 = arith.constant 0 : index
    %33 = vector.load %arg7[%c0_21, %c0_22] : memref<8x128xf32, #tpu.memory_space<vmem>>, vector<8x128xf32>
    tpu.vector_store %arg7[%c0_21, %c0_22], %32 {strides = array<i32>} : memref<8x128xf32, #tpu.memory_space<vmem>>, vector<8x128xf32>,
    %c0_23 = arith.constant 0 : index
    %c0_24 = arith.constant 0 : index
    %34 = vector.load %arg8[%c0_23, %c0_24] : memref<8x128xf32, #tpu.memory_space<vmem>>, vector<8x128xf32>
    tpu.vector_store %arg8[%c0_23, %c0_24], %12#0 {strides = array<i32>} : memref<8x128xf32, #tpu.memory_space<vmem>>, vector<8x128xf32>,
    %c0_25 = arith.constant 0 : index
    %c0_26 = arith.constant 0 : index
    %35 = vector.load %arg9[%c0_25, %c0_26] : memref<8x128xf32, #tpu.memory_space<vmem>>, vector<8x128xf32>
    tpu.vector_store %arg9[%c0_25, %c0_26], %12#1 {strides = array<i32>} : memref<8x128xf32, #tpu.memory_space<vmem>>, vector<8x128xf32>,
    return
  }
  func.func @transform_0(%arg0: i32) -> (i32, i32, i32) {
    %c0_i32 = arith.constant 0 : i32
    %c0_i32_0 = arith.constant 0 : i32
    %c0_i32_1 = arith.constant 0 : i32
    return %arg0, %c0_i32, %c0_i32_0 : i32, i32, i32
  }
  func.func @transform_1(%arg0: i32) -> (i32, i32) {
    %c0_i32 = arith.constant 0 : i32
    %c0_i32_0 = arith.constant 0 : i32
    %c0_i32_1 = arith.constant 0 : i32
    return %c0_i32, %c0_i32_0 : i32, i32
  }
  func.func @transform_2(%arg0: i32) -> (i32, i32) {
    %c0_i32 = arith.constant 0 : i32
    %c0_i32_0 = arith.constant 0 : i32
    %c0_i32_1 = arith.constant 0 : i32
    return %c0_i32, %c0_i32_0 : i32, i32
  }
  func.func @transform_3(%arg0: i32) -> (i32, i32) {
    %c0_i32 = arith.constant 0 : i32
    %c0_i32_0 = arith.constant 0 : i32
    %c0_i32_1 = arith.constant 0 : i32
    return %c0_i32, %c0_i32_0 : i32, i32
  }
  func.func @transform_4(%arg0: i32) -> (i32, i32) {
    %c0_i32 = arith.constant 0 : i32
    %c0_i32_0 = arith.constant 0 : i32
    %c0_i32_1 = arith.constant 0 : i32
    return %c0_i32, %c0_i32_0 : i32, i32
  }
  func.func @transform_5(%arg0: i32) -> (i32, i32) {
    %c0_i32 = arith.constant 0 : i32
    %c0_i32_0 = arith.constant 0 : i32
    %c0_i32_1 = arith.constant 0 : i32
    return %c0_i32, %c0_i32_0 : i32, i32
  }
  func.func @transform_6(%arg0: i32) -> (i32, i32) {
    %c0_i32 = arith.constant 0 : i32
    %c0_i32_0 = arith.constant 0 : i32
    return %arg0, %c0_i32 : i32, i32
  }
  func.func @transform_7(%arg0: i32) -> (i32, i32) {
    %c0_i32 = arith.constant 0 : i32
    %c0_i32_0 = arith.constant 0 : i32
    return %arg0, %c0_i32 : i32, i32
  }
  func.func @transform_8(%arg0: i32) -> (i32, i32) {
    %c0_i32 = arith.constant 0 : i32
    %c0_i32_0 = arith.constant 0 : i32
    return %arg0, %c0_i32 : i32, i32
  }
}

</mosaic_0001>

<bundles_post_ra>
// kernel: tpu_custom_call.1
= control target key start
LH: loop header
LB: loop body
LE: loop exit
PB: predicated region body
PF: predicated region fallthrough
CT: control target
= control target key end

     0   :  { %14 = vsyncpa [#allocation4], 0  ;;  %s1494_s0 = inlined_call_operand.vmem [shape: f32[1,64,16], index: 0, kind: input, shape index: {}]   ;;  %s1495_s1 = inlined_call_operand.vmem [shape: f32[16,512], index: 1, kind: input, shape index: {}]   ;;  %s1496_s2 = inlined_call_operand.hbm [shape: f32[128,512], index: 2, kind: input, shape index: {}]   ;;  %s1497_s3 = inlined_call_operand.vmem [shape: f32[1,512], index: 3, kind: input, shape index: {}]   ;;  %s1498_s4 = inlined_call_operand.hbm [shape: f32[128,128], index: 4, kind: input, shape index: {}]   ;;  %s1499_s5 = inlined_call_operand.vmem [shape: f32[1,128], index: 5, kind: input, shape index: {}]   ;;  %s1500_s6 = inlined_call_operand.hbm [shape: f32[8,128], index: 6, kind: output, shape index: {0}]   ;;  %s1501_s7 = inlined_call_operand.hbm [shape: f32[8,128], index: 7, kind: output, shape index: {1}]   ;;  %s1502_s8 = inlined_call_operand.hbm [shape: f32[8,128], index: 8, kind: output, shape index: {2}]  }
   0x1   :  { %15 = vsyncpa [#allocation7], 0 }
   0x2   :  { %16 = vsyncpa [#allocation5], 0 }
   0x3   :  { %17 = vsyncpa [#allocation10], 0  ;;  %s1059_s27 = smov [#allocation3]  }
   0x4   :  { %s27_s28 = sshll.u32 %s1059_s27, 4  ;;  %s28_s28 = int_to_ptr.vmem [resolvable:$true] %s27_s28 }
   0x5   :  { %s935_s29 = scalar_lea.vmem %s28_s28, 8192  ;;  %p940_p1 = scmp.lt.s32.totalorder %s28_s28, %s28_s28 }
   0x6   :  { %p936_p0 = scmp.ne.s32.totalorder %s28_s28, %s935_s29  ;;  %p941_p2 = scmp.lt.s32.totalorder %s935_s29, %s935_s29 }
   0x8   :  { %p942_p3 = por %p941_p2, %p940_p1 }
   0xa   :  { %p943_p4 = pnand %p942_p3, %p936_p0 }
   0xc   :  { %946 = shalt.err (!%p943_p4)
}
   0xd   :  { %s1060_s30 = smov 512   ;;  %s1061_s9 = smov 32  }
   0xe   :  { %33 = dma.hbm_to_vmem [thread:$0]  %s1496_s2, 8192, %s28_s28, [#allocation4], %s1060_s30, %s1060_s30, %s1061_s9  }
   0xf   :  { %s1062_s12 = smov [#allocation6]  }
  0x10   :  { %s41_s13 = sshll.u32 %s1062_s12, 4  ;;  %s42_s13 = int_to_ptr.vmem [resolvable:$true] %s41_s13 }
  0x11   :  { %s955_s14 = scalar_lea.vmem %s42_s13, 2048  ;;  %p960_p6 = scmp.lt.s32.totalorder %s42_s13, %s42_s13 }
  0x12   :  { %p956_p5 = scmp.ne.s32.totalorder %s42_s13, %s955_s14  ;;  %p961_p7 = scmp.lt.s32.totalorder %s955_s14, %s955_s14 }
  0x14   :  { %p962_p8 = por %p961_p7, %p960_p6 }
  0x16   :  { %p963_p9 = pnand %p962_p8, %p956_p5 }
  0x18   :  { %966 = shalt.err (!%p963_p9)
}
  0x19   :  { %s1063_s15 = smov 128   ;;  %s1064_s16 = smov 8  }
  0x1a   :  { %47 = dma.hbm_to_vmem [thread:$0]  %s1498_s4, 2048, %s42_s13, [#allocation7], %s1063_s15, %s1063_s15, %s1064_s16  }
  0x1b   :  { %1039 = dma.done.wait [#allocation4], 8192  }
  0x1c   :  { %1040 = vsyncadd [#allocation4], 4294959104 }
  0x1d   :  { %1041 = dma.done.wait [#allocation7], 2048  }
  0x1e   :  { %1042 = vsyncadd [#allocation7], 4294965248  ;;  %v1503_v0 = vmov 0.0   ;;  %v1124_v1 = vld [vmem:[#allocation3] sm:$0xff]  ;;  %v1126_v2 = vld [vmem:[#allocation3 + $0x8] sm:$0xff]  ;;  %vm94_vm0 = vcmask 130048  }
  0x1f   :  { %183 = vmatprep.mubr.f32.mxu0 %v1503_v0  ;;  %296 = vmatprep.mubr.f32.mxu1 %v1503_v0  ;;  %1507 = vst [vmem:[#allocation16_spill] sm:$0xff] %v1124_v1  ;;  %1508 = vst [vmem:[#allocation17_spill] sm:$0xff] %v1126_v2  ;;  %v1128_v3 = vld [vmem:[#allocation3 + $0x10] sm:$0xff]  ;;  %v1130_v4 = vld [vmem:[#allocation3 + $0x18] sm:$0xff] }
  0x20   :  { %1509 = vst [vmem:[#allocation18_spill] sm:$0xff] %v1128_v3  ;;  %1510 = vst [vmem:[#allocation19_spill] sm:$0xff] %v1130_v4  ;;  %v1132_v5 = vld [vmem:[#allocation3 + $0x20] sm:$0xff]  ;;  %v1134_v6 = vld [vmem:[#allocation3 + $0x28] sm:$0xff] }
  0x21   :  { %1511 = vst [vmem:[#allocation20_spill] sm:$0xff] %v1132_v5  ;;  %1512 = vst [vmem:[#allocation21_spill] sm:$0xff] %v1134_v6  ;;  %v1136_v7 = vld [vmem:[#allocation3 + $0x30] sm:$0xff]  ;;  %v1138_v8 = vld [vmem:[#allocation3 + $0x38] sm:$0xff] }
  0x22   :  { %1513 = vst [vmem:[#allocation22_spill] sm:$0xff] %v1136_v7  ;;  %1514 = vst [vmem:[#allocation23_spill] sm:$0xff] %v1138_v8  ;;  %v1140_v9 = vld [vmem:[#allocation3 + $0x40] sm:$0xff]  ;;  %v1142_v10 = vld [vmem:[#allocation3 + $0x48] sm:$0xff] }
  0x23   :  { %1515 = vst [vmem:[#allocation24_spill] sm:$0xff] %v1140_v9  ;;  %1516 = vst [vmem:[#allocation25_spill] sm:$0xff] %v1142_v10  ;;  %v1144_v11 = vld [vmem:[#allocation3 + $0x50] sm:$0xff]  ;;  %v1146_v12 = vld [vmem:[#allocation3 + $0x58] sm:$0xff] }
  0x24   :  { %1517 = vst [vmem:[#allocation26_spill] sm:$0xff] %v1144_v11  ;;  %1518 = vst [vmem:[#allocation27_spill] sm:$0xff] %v1146_v12  ;;  %v1148_v13 = vld [vmem:[#allocation3 + $0x60] sm:$0xff]  ;;  %v1150_v14 = vld [vmem:[#allocation3 + $0x68] sm:$0xff] }
  0x25   :  { %1519 = vst [vmem:[#allocation28_spill] sm:$0xff] %v1148_v13  ;;  %1520 = vst [vmem:[#allocation29_spill] sm:$0xff] %v1150_v14  ;;  %v1152_v15 = vld [vmem:[#allocation3 + $0x70] sm:$0xff]  ;;  %v1154_v16 = vld [vmem:[#allocation3 + $0x78] sm:$0xff] }
  0x26   :  { %1521 = vst [vmem:[#allocation30_spill] sm:$0xff] %v1152_v15  ;;  %1522 = vst [vmem:[#allocation31_spill] sm:$0xff] %v1154_v16  ;;  %v1156_v17 = vld [vmem:[#allocation3 + $0x80] sm:$0xff]  ;;  %v1158_v18 = vld [vmem:[#allocation3 + $0x88] sm:$0xff] }
  0x27   :  { %1523 = vst [vmem:[#allocation32_spill] sm:$0xff] %v1156_v17  ;;  %1524 = vst [vmem:[#allocation33_spill] sm:$0xff] %v1158_v18  ;;  %v1160_v19 = vld [vmem:[#allocation3 + $0x90] sm:$0xff]  ;;  %v1162_v20 = vld [vmem:[#allocation3 + $0x98] sm:$0xff] }
  0x28   :  { %1525 = vst [vmem:[#allocation34_spill] sm:$0xff] %v1160_v19  ;;  %v1164_v21 = vld [vmem:[#allocation3 + $0xa0] sm:$0xff]  ;;  %v1166_v22 = vld [vmem:[#allocation3 + $0xa8] sm:$0xff]  ;;  %v1168_v23 = vld [vmem:[#allocation3 + $0xb0] sm:$0xff] }
  0x29   :  { %v1170_v24 = vld [vmem:[#allocation3 + $0xb8] sm:$0xff]  ;;  %v1172_v25 = vld [vmem:[#allocation3 + $0xc0] sm:$0xff]  ;;  %v1174_v26 = vld [vmem:[#allocation3 + $0xc8] sm:$0xff] }
  0x2a   :  { %v1176_v27 = vld [vmem:[#allocation3 + $0xd0] sm:$0xff]  ;;  %v1178_v28 = vld [vmem:[#allocation3 + $0xd8] sm:$0xff]  ;;  %v1180_v29 = vld [vmem:[#allocation3 + $0xe0] sm:$0xff] }
  0x2b   :  { %v1182_v30 = vld [vmem:[#allocation3 + $0xe8] sm:$0xff]  ;;  %v1184_v31 = vld [vmem:[#allocation3 + $0xf0] sm:$0xff]  ;;  %v1186_v32 = vld [vmem:[#allocation3 + $0xf8] sm:$0xff] }
  0x2c   :  { %v1188_v33 = vld [vmem:[#allocation3 + $0x100] sm:$0xff]  ;;  %v1190_v34 = vld [vmem:[#allocation3 + $0x108] sm:$0xff]  ;;  %v1192_v35 = vld [vmem:[#allocation3 + $0x110] sm:$0xff] }
  0x2d   :  { %v1194_v36 = vld [vmem:[#allocation3 + $0x118] sm:$0xff]  ;;  %v1196_v37 = vld [vmem:[#allocation3 + $0x120] sm:$0xff]  ;;  %v1198_v38 = vld [vmem:[#allocation3 + $0x128] sm:$0xff] }
  0x2e   :  { %v1200_v39 = vld [vmem:[#allocation3 + $0x130] sm:$0xff]  ;;  %v1202_v40 = vld [vmem:[#allocation3 + $0x138] sm:$0xff]  ;;  %v1204_v41 = vld [vmem:[#allocation3 + $0x140] sm:$0xff] }
  0x2f   :  { %v1206_v42 = vld [vmem:[#allocation3 + $0x148] sm:$0xff]  ;;  %v1208_v43 = vld [vmem:[#allocation3 + $0x150] sm:$0xff]  ;;  %v1210_v44 = vld [vmem:[#allocation3 + $0x158] sm:$0xff] }
  0x30   :  { %v1212_v45 = vld [vmem:[#allocation3 + $0x160] sm:$0xff]  ;;  %v1214_v46 = vld [vmem:[#allocation3 + $0x168] sm:$0xff]  ;;  %v1216_v47 = vld [vmem:[#allocation3 + $0x170] sm:$0xff] }
  0x31   :  { %v1218_v48 = vld [vmem:[#allocation3 + $0x178] sm:$0xff]  ;;  %v1220_v49 = vld [vmem:[#allocation3 + $0x180] sm:$0xff]  ;;  %v1222_v50 = vld [vmem:[#allocation3 + $0x188] sm:$0xff] }
  0x32   :  { %v1224_v51 = vld [vmem:[#allocation3 + $0x190] sm:$0xff]  ;;  %v1226_v52 = vld [vmem:[#allocation3 + $0x198] sm:$0xff]  ;;  %v1228_v53 = vld [vmem:[#allocation3 + $0x1a0] sm:$0xff] }
  0x33   :  { %v1230_v54 = vld [vmem:[#allocation3 + $0x1a8] sm:$0xff]  ;;  %v1232_v55 = vld [vmem:[#allocation3 + $0x1b0] sm:$0xff]  ;;  %v1234_v56 = vld [vmem:[#allocation3 + $0x1b8] sm:$0xff] }
  0x34   :  { %v1236_v57 = vld [vmem:[#allocation3 + $0x1c0] sm:$0xff]  ;;  %v1238_v58 = vld [vmem:[#allocation3 + $0x1c8] sm:$0xff]  ;;  %v1240_v59 = vld [vmem:[#allocation3 + $0x1d0] sm:$0xff] }
  0x35   :  { %v1242_v60 = vld [vmem:[#allocation3 + $0x1d8] sm:$0xff]  ;;  %v1244_v61 = vld [vmem:[#allocation3 + $0x1e0] sm:$0xff]  ;;  %v1246_v62 = vld [vmem:[#allocation3 + $0x1e8] sm:$0xff] }
  0x36   :  { %v1248_v63 = vld [vmem:[#allocation3 + $0x1f0] sm:$0xff]  ;;  %v1250_v0 = vld [vmem:[#allocation3 + $0x1f8] sm:$0xff]  ;;  %v69_v3 = vld [vmem:[%s1495_s1 + $0x28] sm:$0xff] }
  0x37   :  { %1526 = vst [vmem:[#allocation35_spill] sm:$0xff] %v1250_v0  ;;  %v71_v4 = vld [vmem:[%s1495_s1 + $0x38] sm:$0xff]  ;;  %147 = vmatprep.subr.mxu0 %v69_v3  ;;  %v68_v1 = vld [vmem:[%s1495_s1 + $0x20] sm:$0xff]  ;;  %v70_v7 = vld [vmem:[%s1495_s1 + $0x30] sm:$0xff] }
  0x38   :  { %260 = vmatprep.subr.mxu1 %v71_v4  ;;  %v65_v2 = vld [vmem:[%s1495_s1 + $0x8] sm:$0xff]  ;;  %148 = vmatpush1.msra.mxu0 %v68_v1  ;;  %v67_v8 = vld [vmem:[%s1495_s1 + $0x18] sm:$0xff]  ;;  %v64_v3 = vld [vmem:[%s1495_s1] sm:$0xff] }
  0x39   :  { %261 = vmatpush1.msra.mxu1 %v70_v7  ;;  %v66_v4 = vld [vmem:[%s1495_s1 + $0x10] sm:$0xff]  ;;  %149 = vmatprep.subr.mxu0 %v65_v2  ;;  %v56_v1 = vld [vmem:[%s1494_s0] sm:$0xff]  ;;  %v1527_v7 = vmov 0.0   ;;  %v57_v5 = vld [vmem:[%s1494_s0 + $0x8] sm:$0xff] }
  0x3a   :  { %262 = vmatprep.subr.mxu1 %v67_v8  ;;  %150 = vmatpush1.msra.mxu0 %v64_v3  ;;  %v58_v2 = vld [vmem:[%s1494_s0 + $0x10] sm:$0xff]  ;;  %v60_v8 = vld [vmem:[%s1494_s0 + $0x20] sm:$0xff]  ;;  %v61_v3 = vld [vmem:[%s1494_s0 + $0x28] sm:$0xff] }
  0x3b   :  { %263 = vmatpush1.msra.mxu1 %v66_v4  ;;  %795 = vmatmul.mubr.msk.f32.vlgmr.msra.gmra.mxu0 %vm94_vm0, %v56_v1  ;;  %v62_v4 = vld [vmem:[%s1494_s0 + $0x30] sm:$0xff] }
  0x3c   :  { %803 = vmatmul.mubr.msk.f32.vlgmr.msra.gmra.mxu1 %vm94_vm0, %v56_v1  ;;  %189 = vmatprep.mubr.f32.mxu0 %v1527_v7  ;;  %v63_v1 = vld [vmem:[%s1494_s0 + $0x38] sm:$0xff] }
  0x3d   :  { %302 = vmatprep.mubr.f32.mxu1 %v1527_v7 }
  0x3f   :  { %796 = vmatmul.mubr.msk.f32.gmra.mxu0 %vm94_vm0, %v57_v5 }
  0x40   :  { %804 = vmatmul.mubr.msk.f32.gmra.mxu1 %vm94_vm0, %v57_v5  ;;  %195 = vmatprep.mubr.f32.mxu0 %v1527_v7  ;;  %v59_v5 = vld [vmem:[%s1494_s0 + $0x18] sm:$0xff]  ;;  %s1378_s0 = smov 0  }
  0x41   :  { %308 = vmatprep.mubr.f32.mxu1 %v1527_v7 }
  0x43   :  { %797 = vmatmul.mubr.msk.f32.gmra.mxu0 %vm94_vm0, %v58_v2 }
  0x44   :  { %805 = vmatmul.mubr.msk.f32.gmra.mxu1 %vm94_vm0, %v58_v2  ;;  %201 = vmatprep.mubr.f32.mxu0 %v1527_v7  ;;  %v1506_v2 = vlaneseq }
  0x45   :  { %314 = vmatprep.mubr.f32.mxu1 %v1527_v7 }
  0x47   :  { %798 = vmatmul.mubr.msk.f32.gmra.mxu0 %vm94_vm0, %v59_v5 }
  0x48   :  { %806 = vmatmul.mubr.msk.f32.gmra.mxu1 %vm94_vm0, %v59_v5  ;;  %207 = vmatprep.mubr.f32.mxu0 %v1527_v7  ;;  %v75_v5 = vshrl.u32 %v1506_v2, 7 }
  0x49   :  { %320 = vmatprep.mubr.f32.mxu1 %v1527_v7 }
  0x4a   :  { %v80_v11 = vsub.s32 1, %v75_v5  ;;  %v88_v6 = vsub.s32 3, %v75_v5 }
  0x4b   :  { %799 = vmatmul.mubr.msk.f32.gmra.mxu0 %vm94_vm0, %v60_v8 }
  0x4c   :  { %807 = vmatmul.mubr.msk.f32.gmra.mxu1 %vm94_vm0, %v60_v8  ;;  %213 = vmatprep.mubr.f32.mxu0 %v1527_v7  ;;  %v76_v8 = vsub.s32 0, %v75_v5 }
  0x4d   :  { %326 = vmatprep.mubr.f32.mxu1 %v1527_v7 }
  0x4f   :  { %800 = vmatmul.mubr.msk.f32.gmra.mxu0 %vm94_vm0, %v61_v3 }
  0x50   :  { %808 = vmatmul.mubr.msk.f32.gmra.mxu1 %vm94_vm0, %v61_v3  ;;  %219 = vmatprep.mubr.f32.mxu0 %v1527_v7  ;;  %v84_v3 = vsub.s32 2, %v75_v5 }
  0x51   :  { %332 = vmatprep.mubr.f32.mxu1 %v1527_v7 }
  0x53   :  { %801 = vmatmul.mubr.msk.f32.gmra.mxu0 %vm94_vm0, %v62_v4 }
  0x54   :  { %809 = vmatmul.mubr.msk.f32.gmra.mxu1 %vm94_vm0, %v62_v4  ;;  %225 = vmatprep.mubr.f32.mxu0 %v1527_v7  ;;  %v72_v4 = vld [vmem:[%s1497_s3] sm:$0xf] }
  0x55   :  { %338 = vmatprep.mubr.f32.mxu1 %v1527_v7  ;;  %v1334_v7 = vrot.slane %v72_v4, %v76_v8  ;;  %v1336_v12 = vrot.slane %v72_v4, %v84_v3  ;;  %v1338_v9 = vrot.slane %v72_v4, %v80_v11  ;;  %v1340_v15 = vrot.slane %v72_v4, %v88_v6 }
  0x57   :  { %802 = vmatmul.mubr.msk.f32.gmra.mxu0 %vm94_vm0, %v63_v1 }
  0x58   :  { %810 = vmatmul.mubr.msk.f32.gmra.mxu1 %vm94_vm0, %v63_v1 }
  0xfb   :  { %v185_v1 = vpop.f32.mrf.mxu0 }
  0xfc   :  { %v298_v10 = vpop.f32.mrf.mxu1  ;;  %v186_v2 = vadd.f32 %v185_v1, %v1334_v7 }
  0xfd   :  { %v299_v16 = vadd.f32 %v298_v10, %v1336_v12  ;;  %v187_v13 = vpop.f32.mrf.mxu0 }
  0xfe   :  { %v300_v19 = vpop.f32.mrf.mxu1  ;;  %345 = vst [vmem:[#allocation2] sm:$0xff] %v186_v2  ;;  %v188_v5 = vadd.f32 %v187_v13, %v1338_v9 }
  0xff   :  { %347 = vst [vmem:[#allocation2 + $0x10] sm:$0xff] %v299_v16  ;;  %v301_v8 = vadd.f32 %v300_v19, %v1340_v15  ;;  %v191_v3 = vpop.f32.mrf.mxu0 }
 0x100   :  { %v304_v14 = vpop.f32.mrf.mxu1  ;;  %346 = vst [vmem:[#allocation2 + $0x8] sm:$0xff] %v188_v5  ;;  %v192_v6 = vadd.f32 %v191_v3, %v1334_v7 }
 0x101   :  { %348 = vst [vmem:[#allocation2 + $0x18] sm:$0xff] %v301_v8  ;;  %v305_v11 = vadd.f32 %v304_v14, %v1336_v12  ;;  %v193_v4 = vpop.f32.mrf.mxu0 }
 0x102   :  { %v306_v1 = vpop.f32.mrf.mxu1  ;;  %349 = vst [vmem:[#allocation2 + $0x20] sm:$0xff] %v192_v6  ;;  %v194_v10 = vadd.f32 %v193_v4, %v1338_v9 }
 0x103   :  { %351 = vst [vmem:[#allocation2 + $0x30] sm:$0xff] %v305_v11  ;;  %v307_v16 = vadd.f32 %v306_v1, %v1340_v15  ;;  %v197_v2 = vpop.f32.mrf.mxu0 }
 0x104   :  { %v310_v13 = vpop.f32.mrf.mxu1  ;;  %350 = vst [vmem:[#allocation2 + $0x28] sm:$0xff] %v194_v10  ;;  %v198_v19 = vadd.f32 %v197_v2, %v1334_v7 }
 0x105   :  { %352 = vst [vmem:[#allocation2 + $0x38] sm:$0xff] %v307_v16  ;;  %v311_v5 = vadd.f32 %v310_v13, %v1336_v12  ;;  %v199_v8 = vpop.f32.mrf.mxu0 }
 0x106   :  { %v312_v3 = vpop.f32.mrf.mxu1  ;;  %353 = vst [vmem:[#allocation2 + $0x40] sm:$0xff] %v198_v19  ;;  %v200_v14 = vadd.f32 %v199_v8, %v1338_v9 }
 0x107   :  { %355 = vst [vmem:[#allocation2 + $0x50] sm:$0xff] %v311_v5  ;;  %v313_v6 = vadd.f32 %v312_v3, %v1340_v15  ;;  %v203_v11 = vpop.f32.mrf.mxu0 }
 0x108   :  { %v316_v4 = vpop.f32.mrf.mxu1  ;;  %354 = vst [vmem:[#allocation2 + $0x48] sm:$0xff] %v200_v14  ;;  %v204_v1 = vadd.f32 %v203_v11, %v1334_v7 }
 0x109   :  { %356 = vst [vmem:[#allocation2 + $0x58] sm:$0xff] %v313_v6  ;;  %v317_v10 = vadd.f32 %v316_v4, %v1336_v12  ;;  %v205_v16 = vpop.f32.mrf.mxu0 }
 0x10a   :  { %v318_v2 = vpop.f32.mrf.mxu1  ;;  %357 = vst [vmem:[#allocation2 + $0x60] sm:$0xff] %v204_v1  ;;  %v206_v13 = vadd.f32 %v205_v16, %v1338_v9 }
 0x10b   :  { %359 = vst [vmem:[#allocation2 + $0x70] sm:$0xff] %v317_v10  ;;  %v319_v19 = vadd.f32 %v318_v2, %v1340_v15  ;;  %v209_v5 = vpop.f32.mrf.mxu0 }
 0x10c   :  { %v322_v8 = vpop.f32.mrf.mxu1  ;;  %358 = vst [vmem:[#allocation2 + $0x68] sm:$0xff] %v206_v13  ;;  %v210_v3 = vadd.f32 %v209_v5, %v1334_v7 }
 0x10d   :  { %360 = vst [vmem:[#allocation2 + $0x78] sm:$0xff] %v319_v19  ;;  %v323_v14 = vadd.f32 %v322_v8, %v1336_v12  ;;  %v211_v6 = vpop.f32.mrf.mxu0 }
 0x10e   :  { %v324_v11 = vpop.f32.mrf.mxu1  ;;  %361 = vst [vmem:[#allocation2 + $0x80] sm:$0xff] %v210_v3  ;;  %v212_v4 = vadd.f32 %v211_v6, %v1338_v9 }
 0x10f   :  { %363 = vst [vmem:[#allocation2 + $0x90] sm:$0xff] %v323_v14  ;;  %v325_v1 = vadd.f32 %v324_v11, %v1340_v15  ;;  %v215_v10 = vpop.f32.mrf.mxu0 }
 0x110   :  { %v328_v16 = vpop.f32.mrf.mxu1  ;;  %362 = vst [vmem:[#allocation2 + $0x88] sm:$0xff] %v212_v4  ;;  %v216_v2 = vadd.f32 %v215_v10, %v1334_v7 }
 0x111   :  { %364 = vst [vmem:[#allocation2 + $0x98] sm:$0xff] %v325_v1  ;;  %v329_v13 = vadd.f32 %v328_v16, %v1336_v12  ;;  %v217_v19 = vpop.f32.mrf.mxu0 }
 0x112   :  { %v330_v5 = vpop.f32.mrf.mxu1  ;;  %365 = vst [vmem:[#allocation2 + $0xa0] sm:$0xff] %v216_v2  ;;  %v218_v8 = vadd.f32 %v217_v19, %v1338_v9 }
 0x113   :  { %367 = vst [vmem:[#allocation2 + $0xb0] sm:$0xff] %v329_v13  ;;  %v331_v3 = vadd.f32 %v330_v5, %v1340_v15  ;;  %v221_v14 = vpop.f32.mrf.mxu0 }
 0x114   :  { %v334_v6 = vpop.f32.mrf.mxu1  ;;  %366 = vst [vmem:[#allocation2 + $0xa8] sm:$0xff] %v218_v8  ;;  %v222_v11 = vadd.f32 %v221_v14, %v1334_v7 }
 0x115   :  { %368 = vst [vmem:[#allocation2 + $0xb8] sm:$0xff] %v331_v3  ;;  %v335_v4 = vadd.f32 %v334_v6, %v1336_v12  ;;  %v223_v1 = vpop.f32.mrf.mxu0 }
 0x116   :  { %v336_v10 = vpop.f32.mrf.mxu1  ;;  %369 = vst [vmem:[#allocation2 + $0xc0] sm:$0xff] %v222_v11  ;;  %v224_v16 = vadd.f32 %v223_v1, %v1338_v9  ;;  %v1376_v1 = vmov 0.0  }
 0x117   :  { %371 = vst [vmem:[#allocation2 + $0xd0] sm:$0xff] %v335_v4  ;;  %v337_v2 = vadd.f32 %v336_v10, %v1340_v15  ;;  %v227_v13 = vpop.f32.mrf.mxu0  ;;  %v1374_v4 = vmov 0.0  }
 0x118   :  { %v340_v19 = vpop.f32.mrf.mxu1  ;;  %370 = vst [vmem:[#allocation2 + $0xc8] sm:$0xff] %v224_v16  ;;  %v228_v5 = vadd.f32 %v227_v13, %v1334_v7 }
 0x119   :  { %372 = vst [vmem:[#allocation2 + $0xd8] sm:$0xff] %v337_v2  ;;  %v341_v8 = vadd.f32 %v340_v19, %v1336_v12  ;;  %v229_v3 = vpop.f32.mrf.mxu0 }
 0x11a   :  { %v342_v14 = vpop.f32.mrf.mxu1  ;;  %373 = vst [vmem:[#allocation2 + $0xe0] sm:$0xff] %v228_v5  ;;  %v230_v6 = vadd.f32 %v229_v3, %v1338_v9 }
 0x11b   :  { %375 = vst [vmem:[#allocation2 + $0xf0] sm:$0xff] %v341_v8  ;;  %v343_v11 = vadd.f32 %v342_v14, %v1340_v15 }
 0x11c   :  { %374 = vst [vmem:[#allocation2 + $0xe8] sm:$0xff] %v230_v6 }
 0x11d   :  { %376 = vst [vmem:[#allocation2 + $0xf8] sm:$0xff] %v343_v11 }
 0x11e LB: > { %459 = vmatprep.subr.mxu0 %v1246_v62  ;;  %v1528_v0 = vld [vmem:[#allocation35_spill] sm:$0xff]  ;;  %v1066_v9 = vmov 0.0   ;;  %v1529_v18 = vld [vmem:[#allocation33_spill] sm:$0xff]  ;;  %v1530_v17 = vld [vmem:[#allocation32_spill] sm:$0xff]  ;;  %s811_s3 = sshll.u32 %s1057_s0, 3  ;;  %s446_s0 = sadd.s32 1, %s1057_s0   ;;  %s1057_s0 = sphi %s1378_s0, %s446_s0   ;;  %v1053_v1 = vphi %v1376_v1, %v1549_v1   ;;  %v1049_v4 = vphi %v1374_v4, %v1548_v4  }
 0x11f   : > { %530 = vmatprep.subr.mxu1 %v1528_v0  ;;  %460 = vmatpush1.msra.mxu0 %v1244_v61  ;;  %v1531_v12 = vld [vmem:[#allocation29_spill] sm:$0xff]  ;;  %v1532_v15 = vld [vmem:[#allocation34_spill] sm:$0xff]  ;;  %v1533_v7 = vld [vmem:[#allocation28_spill] sm:$0xff]  ;;  %s450_s26 = sshra.s32 %s811_s3, 3  ;;  %p443_p10 = scmp.ge.s32.totalorder %s446_s0, 8  }
 0x120   : > { %531 = vmatpush1.msra.mxu1 %v1248_v63  ;;  %461 = vmatprep.subr.mxu0 %v1238_v58  ;;  %v1534_v10 = vld [vmem:[#allocation31_spill] sm:$0xff]  ;;  %v1535_v16 = vld [vmem:[#allocation25_spill] sm:$0xff]  ;;  %v1536_v2 = vld [vmem:[#allocation30_spill] sm:$0xff]  ;;  %s818_s27 = sshll.u32 %s450_s26, 5  ;;  %vm1067_vm1 = vmmov (%p443_p10), 0   ;;  %s1068_s9 = smov (%p443_p10), [#allocation9]  }
 0x121   : > { %532 = vmatprep.subr.mxu1 %v1242_v60  ;;  %462 = vmatpush1.msra.mxu0 %v1236_v57  ;;  %v1537_v13 = vld [vmem:[#allocation24_spill] sm:$0xff]  ;;  %v1538_v19 = vld [vmem:[#allocation27_spill] sm:$0xff]  ;;  %v1539_v5 = vld [vmem:[#allocation21_spill] sm:$0xff]  ;;  %s454_s28 = scalar_lea.vmem [#allocation2], %s818_s27  ;;  %s755_s10 = sshll.u32 (%p443_p10), %s1068_s9, 4  ;;  %s756_s10 = int_to_ptr.vmem [resolvable:$true] %s755_s10 }
 0x122   : > { %533 = vmatpush1.msra.mxu1 %v1240_v59  ;;  %463 = vmatprep.subr.mxu0 %v1230_v54  ;;  %v1540_v8 = vld [vmem:[#allocation26_spill] sm:$0xff]  ;;  %v1541_v3 = vld [vmem:[#allocation20_spill] sm:$0xff]  ;;  %v1542_v14 = vld [vmem:[#allocation23_spill] sm:$0xff]  ;;  %s967_s11 = scalar_lea.vmem (%p443_p10), %s756_s10, 128  ;;  %p972_p12 = scmp.lt.s32.totalorder (%p443_p10), %s756_s10, %s756_s10 }
 0x123   : > { %534 = vmatprep.subr.mxu1 %v1234_v56  ;;  %464 = vmatpush1.msra.mxu0 %v1228_v53  ;;  %v1543_v6 = vld [vmem:[#allocation17_spill] sm:$0xff]  ;;  %v1544_v11 = vld [vmem:[#allocation22_spill] sm:$0xff]  ;;  %p968_p11 = scmp.ne.s32.totalorder (%p443_p10), %s756_s10, %s967_s11  ;;  %p973_p13 = scmp.lt.s32.totalorder (%p443_p10), %s967_s11, %s967_s11 }
 0x124   : > { %535 = vmatpush1.msra.mxu1 %v1232_v55  ;;  %465 = vmatprep.subr.mxu0 %v1222_v50 }
 0x125   : > { %536 = vmatprep.subr.mxu1 %v1226_v52  ;;  %466 = vmatpush1.msra.mxu0 %v1220_v49  ;;  %p974_p0 = por (%p443_p10), %p973_p13, %p972_p12 }
 0x126   : > { %537 = vmatpush1.msra.mxu1 %v1224_v51  ;;  %467 = vmatprep.subr.mxu0 %v1214_v46 }
 0x127   : > { %538 = vmatprep.subr.mxu1 %v1218_v48  ;;  %468 = vmatpush1.msra.mxu0 %v1212_v45  ;;  %p975_p1 = pnand (%p443_p10), %p974_p0, %p968_p11 }
 0x128   : > { %539 = vmatpush1.msra.mxu1 %v1216_v47  ;;  %469 = vmatprep.subr.mxu0 %v1206_v42 }
 0x129   : > { %540 = vmatprep.subr.mxu1 %v1210_v44  ;;  %470 = vmatpush1.msra.mxu0 %v1204_v41 }
 0x12a   : > { %541 = vmatpush1.msra.mxu1 %v1208_v43  ;;  %471 = vmatprep.subr.mxu0 %v1198_v38 }
 0x12b   : > { %542 = vmatprep.subr.mxu1 %v1202_v40  ;;  %472 = vmatpush1.msra.mxu0 %v1196_v37 }
 0x12c   : > { %543 = vmatpush1.msra.mxu1 %v1200_v39  ;;  %473 = vmatprep.subr.mxu0 %v1190_v34 }
 0x12d   : > { %544 = vmatprep.subr.mxu1 %v1194_v36  ;;  %474 = vmatpush1.msra.mxu0 %v1188_v33  ;;  %v817_v33 = vld [vmem:[%s1499_s5] ss:$0 sm:$0xff] (%p443_p10) }
 0x12e   : > { %523 = vmatprep.mubr.f32.mxu0 %v1066_v9  ;;  %475 = vmatprep.subr.mxu0 %v1182_v30  ;;  %v629_v30 = vld [vmem:[#allocation6] sm:$0xff] (%p443_p10) }
 0x12f   : > { %545 = vmatpush1.msra.mxu1 %v1192_v35  ;;  %476 = vmatpush1.msra.mxu0 %v1180_v29  ;;  %v630_v29 = vld [vmem:[#allocation6 + $0x8] sm:$0xff] (%p443_p10) }
 0x130   : > { %546 = vmatprep.subr.mxu1 %v1186_v32  ;;  %477 = vmatprep.subr.mxu0 %v1174_v26  ;;  %v633_v26 = vld [vmem:[#allocation6 + $0x20] sm:$0xff] (%p443_p10) }
 0x131   : > { %547 = vmatpush1.msra.mxu1 %v1184_v31  ;;  %478 = vmatpush1.msra.mxu0 %v1172_v25  ;;  %v634_v25 = vld [vmem:[#allocation6 + $0x28] sm:$0xff] (%p443_p10)  ;;  %v1551_v31 = vlaneseq (%p443_p10) }
 0x132   : > { %548 = vmatprep.subr.mxu1 %v1178_v28  ;;  %479 = vmatprep.subr.mxu0 %v1166_v22  ;;  %v637_v22 = vld [vmem:[#allocation6 + $0x40] sm:$0xff] (%p443_p10)  ;;  %v631_v28 = vld [vmem:[#allocation6 + $0x10] sm:$0xff] (%p443_p10) }
 0x133   : > { %549 = vmatpush1.msra.mxu1 %v1176_v27  ;;  %480 = vmatpush1.msra.mxu0 %v1164_v21  ;;  %v639_v21 = vld [vmem:[#allocation6 + $0x50] sm:$0xff] (%p443_p10)  ;;  %v632_v27 = vld [vmem:[#allocation6 + $0x18] sm:$0xff] (%p443_p10)  ;;  %v723_v32 = vand.u32 (%p443_p10), 127, %v1551_v31 }
 0x134   : > { %550 = vmatprep.subr.mxu1 %v1170_v24  ;;  %481 = vmatprep.subr.mxu0 %v1529_v18  ;;  %v635_v24 = vld [vmem:[#allocation6 + $0x30] sm:$0xff] (%p443_p10) }
 0x135   : > { %551 = vmatpush1.msra.mxu1 %v1168_v23  ;;  %482 = vmatpush1.msra.mxu0 %v1530_v17  ;;  %v636_v23 = vld [vmem:[#allocation6 + $0x38] sm:$0xff] (%p443_p10)  ;;  %vm724_vm2 = vcmp.lt.s32.totalorder (%p443_p10), %v723_v32, 4 }
 0x136   : > { %552 = vmatprep.subr.mxu1 %v1162_v20  ;;  %483 = vmatprep.subr.mxu0 %v1531_v12  ;;  %v1545_v12 = vld [vmem:[#allocation16_spill] sm:$0xff] }
 0x137   : > { %553 = vmatpush1.msra.mxu1 %v1532_v15  ;;  %484 = vmatpush1.msra.mxu0 %v1533_v7  ;;  %v1546_v15 = vld [vmem:[#allocation19_spill] sm:$0xff]  ;;  %v1547_v7 = vld [vmem:[#allocation18_spill] sm:$0xff]  ;;  %v640_v20 = vld [vmem:[#allocation6 + $0x58] sm:$0xff] (%p443_p10) }
 0x138   : > { %554 = vmatprep.subr.mxu1 %v1534_v10  ;;  %485 = vmatprep.subr.mxu0 %v1535_v16  ;;  %v455_v10 = vld [vmem:[%s454_s28] sm:$0xff] }
 0x139   : > { %555 = vmatpush1.msra.mxu1 %v1536_v2  ;;  %486 = vmatpush1.msra.mxu0 %v1537_v13  ;;  %v456_v2 = vld [vmem:[%s454_s28 + $0x8] sm:$0xff] }
 0x13a   : > { %556 = vmatprep.subr.mxu1 %v1538_v19  ;;  %487 = vmatprep.subr.mxu0 %v1539_v5 }
 0x13b   : > { %557 = vmatpush1.msra.mxu1 %v1540_v8  ;;  %488 = vmatpush1.msra.mxu0 %v1541_v3 }
 0x13c   : > { %558 = vmatprep.subr.mxu1 %v1542_v14  ;;  %489 = vmatprep.subr.mxu0 %v1543_v6  ;;  %v458_v6 = vld [vmem:[%s454_s28 + $0x18] sm:$0xff] }
 0x13d   : > { %559 = vmatpush1.msra.mxu1 %v1544_v11  ;;  %490 = vmatpush1.msra.mxu0 %v1545_v12 }
 0x13e   : > { %560 = vmatprep.subr.mxu1 %v1546_v15  ;;  %524 = vmatmul.mubr.f32.vlgmr.msra.gmra.mxu0 %v1053_v1 }
 0x13f   : > { %561 = vmatpush1.msra.mxu1 %v1547_v7  ;;  %594 = vmatprep.mubr.f32.mxu1 %v1066_v9  ;;  %v457_v9 = vld [vmem:[%s454_s28 + $0x10] sm:$0xff] }
 0x140   : > { %595 = vmatmul.mubr.f32.vlgmr.msra.gmra.mxu1 %v1053_v1 }
 0x1fe   : > { %v525_v16 = vpop.f32.mrf.mxu0 }
 0x1ff   : > { %v601_v13 = vadd.f32 %v525_v16, %v455_v10 }
 0x200   : > { %v527_v19 = vpop.f32.mrf.mxu0  ;;  %v596_v14 = vpop.f32.mrf.mxu1 }
 0x201   : > { %v814_v5 = vmul.f32 -1.442695, %v601_v13  ;;  %v602_v8 = vadd.f32 %v527_v19, %v456_v2  ;;  %v603_v1 = vadd.f32 %v596_v14, %v457_v9  ;;  %v643_v9 = vld [vmem:[#allocation6 + $0x70] sm:$0xff] (%p443_p10) }
 0x202   : > { %v598_v11 = vpop.f32.mrf.mxu1 }
 0x203   : > { %907 = vpow2.f32 %v814_v5  ;;  %v815_v3 = vmul.f32 -1.442695, %v602_v8  ;;  %v604_v12 = vadd.f32 %v598_v11, %v458_v6 }
 0x205   : > { %909 = vpow2.f32 %v815_v3  ;;  %v816_v15 = vmul.f32 -1.442695, %v604_v12  ;;  %v642_v12 = vld [vmem:[#allocation6 + $0x68] sm:$0xff] (%p443_p10) }
 0x206   : > { %911 = vtanh.f32 %v603_v1 }
 0x207   : > { %913 = vpow2.f32 %v816_v15 }
 0x210   : > { %v908_v7 = vpop.eup %907 }
 0x211   : > { %v608_v0 = vadd.f32 1.0, %v908_v7 }
 0x212   : > { %v910_v17 = vpop.eup %909 }
 0x213   : > { %915 = vrcp.f32 %v608_v0  ;;  %v614_v10 = vadd.f32 1.0, %v910_v17  ;;  %v912_v16 = vpop.eup %911  ;;  %v1550_v0 = vmov (%p443_p10), 0.0   ;;  %v644_v17 = vld [vmem:[#allocation6 + $0x78] sm:$0xff] (%p443_p10) }
 0x214   : > { %v914_v2 = vpop.eup %913  ;;  %836 = vmatprep.subr.mxu0 (%p443_p10), %v1550_v0  ;;  %868 = vmatprep.mubr.msk.f32.mxu0 (%p443_p10), %vm1067_vm1, %v1550_v0 }
 0x215   : > { %917 = vrcp.f32 %v614_v10  ;;  %v621_v5 = vadd.f32 1.0, %v914_v2  ;;  %837 = vmatpush3.msra.mxu0 (%p443_p10), %v644_v17 }
 0x216   :  { %838 = vmatprep.subr.mxu0 (%p443_p10), %v1550_v0 }
 0x217   : > { %919 = vrcp.f32 %v621_v5  ;;  %839 = vmatpush3.msra.mxu0 (%p443_p10), %v643_v9 }
 0x218   :  { %840 = vmatprep.subr.mxu0 (%p443_p10), %v1550_v0 }
 0x219   :  { %841 = vmatpush3.msra.mxu0 (%p443_p10), %v642_v12 }
 0x21a   :  { %842 = vmatprep.subr.mxu0 (%p443_p10), %v1550_v0 }
 0x220   : > { %v916_v13 = vpop.eup %915 }
 0x221   : > { %v625_v3 = vmul.f32 %v916_v13, %v912_v16 }
 0x222   : > { %v918_v19 = vpop.eup %917 }
 0x223   : > { %v624_v8 = vmul.f32 %v1049_v4, %v918_v19 }
 0x224   : > { %v920_v14 = vpop.eup %919 }
 0x225   : > { %v626_v18 = vadd.f32 %v625_v3, %v624_v8  }
 0x227   : > { %921 = vtanh.f32 %v626_v18  ;;  %v1548_v4 = vmov %v626_v18  ;;  %738 = vst [vmem:[#allocation11] sm:$0xff] (%p443_p10), %v626_v18  ;;  %v638_v18 = vld [vmem:[#allocation6 + $0x48] sm:$0xff] (%p443_p10) }
 0x233   :  { %445 = sbr.rel (!%p443_p10) target bundleno = 286 (0x11e), region = 76 }
 0x234   : > { %v922_v6 = vpop.eup %921 }
 0x235   : > { %v628_v11 = vmul.f32 %v922_v6, %v920_v14  }
 0x237   : > { %v1549_v1 = vmov %v628_v11  ;;  %737 = vst [vmem:[#allocation9] sm:$0xff] (%p443_p10), %v628_v11 }
 0x238   :  { %v641_v1 = vld [vmem:[#allocation6 + $0x60] sm:$0xff] }
 0x239   :  { %843 = vmatpush3.msra.mxu0 %v641_v1 }
 0x23a   :  { %844 = vmatprep.subr.mxu0 %v1550_v0 }
 0x23b   :  { %845 = vmatpush3.msra.mxu0 %v640_v20 }
 0x23c   :  { %846 = vmatprep.subr.mxu0 %v1550_v0 }
 0x23d   :  { %847 = vmatpush3.msra.mxu0 %v639_v21 }
 0x23e   :  { %848 = vmatprep.subr.mxu0 %v1550_v0 }
 0x23f   :  { %849 = vmatpush3.msra.mxu0 %v638_v18 }
 0x240   :  { %850 = vmatprep.subr.mxu0 %v1550_v0 }
 0x241   :  { %851 = vmatpush3.msra.mxu0 %v637_v22 }
 0x242   :  { %852 = vmatprep.subr.mxu0 %v1550_v0 }
 0x243   :  { %853 = vmatpush3.msra.mxu0 %v636_v23 }
 0x244   :  { %854 = vmatprep.subr.mxu0 %v1550_v0 }
 0x245   :  { %855 = vmatpush3.msra.mxu0 %v635_v24 }
 0x246   :  { %856 = vmatprep.subr.mxu0 %v1550_v0 }
 0x247   :  { %857 = vmatpush3.msra.mxu0 %v634_v25 }
 0x248   :  { %858 = vmatprep.subr.mxu0 %v1550_v0 }
 0x249   :  { %859 = vmatpush3.msra.mxu0 %v633_v26 }
 0x24a   :  { %860 = vmatprep.subr.mxu0 %v1550_v0 }
 0x24b   :  { %861 = vmatpush3.msra.mxu0 %v632_v27 }
 0x24c   :  { %862 = vmatprep.subr.mxu0 %v1550_v0 }
 0x24d   :  { %863 = vmatpush3.msra.mxu0 %v631_v28 }
 0x24e   :  { %864 = vmatprep.subr.mxu0 %v1550_v0 }
 0x24f   :  { %865 = vmatpush3.msra.mxu0 %v630_v29 }
 0x250   :  { %866 = vmatprep.subr.mxu0 %v1550_v0 }
 0x251   :  { %867 = vmatpush3.msra.mxu0 %v629_v30 }
 0x252   :  { %869 = vmatmul.mubr.f32.vlgmr.msra.gmra.mxu0 %v628_v11 }
 0x312   :  { %v718_v34 = vpop.f32.mrf.mxu0 }
 0x313   :  { %v719_v35 = vadd.f32 %v817_v33, %v718_v34 }
 0x314   :  { %v870_v36 = vpop.f32.mrf.mxu0 }
 0x315   :  { %v725_v37 = vsel %vm724_vm2, %v719_v35, -1e+30 }
 0x316   :  { %726 = vmax.xlane.f32.xlu0 %v725_v37 }
 0x39f   :  { %v727_v38 = vpop.xlane.xlu0 %726 }
 0x3a0   :  { %v728_v39 = vsub.f32 %v725_v37, %v727_v38 }
 0x3a2   :  { %v729_v40 = vmul.f32 1.442695, %v728_v39 }
 0x3a4   :  { %923 = vpow2.f32 %v729_v40 }
 0x3b1   :  { %v924_v41 = vpop.eup %923 }
 0x3b2   :  { %731 = vadd.xlane.f32.xlu0 %v924_v41 }
 0x3b3   :  { %978 = shalt.err (!%p975_p1)
}
 0x3b4   :  { %758 = dma.vmem_to_hbm [thread:$0]  %s756_s10, 128, %s1501_s7, [#allocation10]  }
 0x3b5   :  { %s1069_s13 = smov [#allocation11]  }
 0x3b6   :  { %s765_s14 = sshll.u32 %s1069_s13, 4  ;;  %s766_s14 = int_to_ptr.vmem [resolvable:$true] %s765_s14 }
 0x3b7   :  { %s987_s1 = scalar_lea.vmem %s766_s14, 128  ;;  %p992_p3 = scmp.lt.s32.totalorder %s766_s14, %s766_s14 }
 0x3b8   :  { %p988_p2 = scmp.ne.s32.totalorder %s766_s14, %s987_s1  ;;  %p993_p4 = scmp.lt.s32.totalorder %s987_s1, %s987_s1 }
 0x3ba   :  { %p994_p5 = por %p993_p4, %p992_p3 }
 0x3bc   :  { %p995_p6 = pnand %p994_p5, %p988_p2 }
 0x3be   :  { %998 = shalt.err (!%p995_p6)
}
 0x3bf   :  { %768 = dma.vmem_to_hbm [thread:$0]  %s766_s14, 128, %s1502_s8, [#allocation10]  }
 0x3c0   :  { %s1070_s17 = smov [#allocation8]  }
 0x3c1   :  { %s745_s18 = sshll.u32 %s1070_s17, 4  ;;  %s746_s18 = int_to_ptr.vmem [resolvable:$true] %s745_s18 }
 0x3c2   :  { %s1007_s7 = scalar_lea.vmem %s746_s18, 128  ;;  %p1012_p8 = scmp.lt.s32.totalorder %s746_s18, %s746_s18 }
 0x3c3   :  { %p1008_p7 = scmp.ne.s32.totalorder %s746_s18, %s1007_s7  ;;  %p1013_p9 = scmp.lt.s32.totalorder %s1007_s7, %s1007_s7 }
 0x3c5   :  { %p1014_p10 = por %p1013_p9, %p1012_p8 }
 0x3c7   :  { %p1015_p11 = pnand %p1014_p10, %p1008_p7 }
 0x43b   :  { %v732_v42 = vpop.xlane.xlu0 %731 }
 0x43c   :  { %925 = vlog2.f32 %v732_v42 }
 0x449   :  { %v926_v43 = vpop.eup %925 }
 0x44a   :  { %v734_v44 = vmul.f32 0.6931472, %v926_v43 }
 0x44c   :  { %v735_v45 = vsub.f32 %v728_v39, %v734_v44 }
 0x44e   :  { %736 = vst [vmem:[#allocation8] sm:$0xff] %v735_v45 }
 0x44f   :  { %1018 = shalt.err (!%p1015_p11)
}
 0x450   :  { %748 = dma.vmem_to_hbm [thread:$0]  %s746_s18, 128, %s1500_s6, [#allocation5]  }
 0x451   :  { %1043 = dma.done.wait [#allocation5], 128  }
 0x452   :  { %1044 = vsyncadd [#allocation5], 4294967168 }
 0x453   :  { %1045 = dma.done.wait [#allocation10], 256  }
 0x454   :  { %1046 = vsyncadd [#allocation10], 4294967040 }
 0x455   :  { %778 = vsyncpa [#allocation4], 1 }
 0x456   :  { %779 = vsyncpa [#allocation7], 1 }
 0x457   :  { %780 = vsyncpa [#allocation5], 1 }
 0x458   :  { %781 = vsyncpa [#allocation10], 1 }

</bundles_post_ra>
